<compile_context>
chip_gen: v7x
topology: tpu7x:2x2x1
jax: 0.10.0
libtpu: 0.0.40
codegen_flags: <defaults>
</compile_context>

<pallas_src>
import functools

import jax
import jax.numpy as jnp
from jax import lax
from jax.experimental import pallas as pl
from jax.experimental.pallas import tpu as pltpu


def _hamburger_kernel(x_ref, bases_ref, out_ref, *, inv_t, n_steps, mm_dtype,
                      clamp_nonneg):
    """Bt batch elements of Hamburger / NMF, transpose-free coeffT formulation.

    x_ref:     (Bt, D, N)  input slab           (native dtype)
    bases_ref: (Bt, D, R)  initial normalized random bases
    out_ref:   (Bt, D, N)  reconstruction  bases @ coeff^T

    coeff is kept transposed: coeffT has shape (Bt, R, N) so N stays on the
    lane axis everywhere.  State (bases, coeffT) is f32; matmul operands are
    cast to mm_dtype (bf16 by default) with f32 accumulation.
    """
    f32 = jnp.float32
    eps = 1e-6

    x_in = x_ref[...]
    if clamp_nonneg:
        x_in = jnp.maximum(x_in, 0)          # optional self-defense (NMF needs x >= 0)
    x_mm = x_in.astype(mm_dtype)             # (Bt, D, N) single MXU-operand copy
    bases = bases_ref[...].astype(f32)       # (Bt, D, R) f32 state

    def xtb_T(bases):
        # (x^T bases)^T == bases^T x : contract over D -> (Bt, R, N)
        return jnp.einsum("bdr,bdn->brn", bases.astype(mm_dtype), x_mm,
                          preferred_element_type=f32)

    def coeff_update(bases, coeffT):
        # coeff = coeff * (x^T B) / (coeff (B^T B) + eps), in transposed layout:
        # coeffT = coeffT * (B^T x) / ((B^T B) coeffT + eps)   [B^T B symmetric]
        numerT = xtb_T(bases)                                              # (Bt,R,N)
        b_mm = bases.astype(mm_dtype)
        btb = jnp.einsum("bdr,bdk->brk", b_mm, b_mm,
                         preferred_element_type=f32)                       # (Bt,R,R)
        denomT = jnp.einsum("brk,bkn->brn", btb.astype(mm_dtype),
                            coeffT.astype(mm_dtype),
                            preferred_element_type=f32)                    # (Bt,R,N)
        return coeffT * numerT * pl.reciprocal(denomT + eps, approx=True)

    def bases_update(bases, coeffT):
        # bases = bases * (x coeff) / (bases (coeff^T coeff) + eps)
        c_mm = coeffT.astype(mm_dtype)
        numer = jnp.einsum("bdn,brn->bdr", x_mm, c_mm,
                           preferred_element_type=f32)                     # (Bt,D,R)
        ctc = jnp.einsum("brn,bkn->brk", c_mm, c_mm,
                         preferred_element_type=f32)                       # (Bt,R,R)
        denom = jnp.einsum("bdr,brk->bdk", bases.astype(mm_dtype),
                           ctc.astype(mm_dtype),
                           preferred_element_type=f32)                     # (Bt,D,R)
        return bases * numer * pl.reciprocal(denom + eps, approx=True)

    # local_inference init: coeff = softmax(inv_t * x^T B, dim=-1) -> softmax
    # over the R axis (axis=1) of coeffT.
    s = inv_t * xtb_T(bases)                                               # (Bt,R,N)
    s = s - jnp.max(s, axis=1, keepdims=True)
    e = jnp.exp(s)
    coeffT = e * pl.reciprocal(jnp.sum(e, axis=1, keepdims=True), approx=True)

    # iterative NMF local steps (fori_loop bounds live ranges / spills)
    def body(_, carry):
        bases, coeffT = carry
        coeffT = coeff_update(bases, coeffT)
        bases = bases_update(bases, coeffT)
        return (bases, coeffT)

    bases, coeffT = lax.fori_loop(0, n_steps, body, (bases, coeffT))

    # compute_coeff: one final coeff refinement
    coeffT = coeff_update(bases, coeffT)

    # reconstruction: bases @ coeff^T -> (Bt, D, N), lane-dense over N
    recon = jnp.einsum("bdr,brn->bdn", bases.astype(mm_dtype),
                       coeffT.astype(mm_dtype), preferred_element_type=f32)
    out_ref[...] = recon.astype(out_ref.dtype)


def _vmem_capacity_bytes():
    try:
        return int(pltpu.get_tpu_info().vmem_capacity_bytes)
    except Exception:
        return 128 << 20  # conservative fallback (v5e/v6e physical VMEM)


def hamburger_pallas(x, bases, *, S=1, inv_t=1.0, spatial=True, n_steps=6,
                     matmul_dtype=jnp.bfloat16, clamp_nonneg=False):
    """Hamburger forward.  x: (B, C, H, W) NCHW, bases: (B*S, D, R)."""
    B, C, H, W = x.shape
    if spatial:
        D = C // S
        N = H * W
        xr = x.reshape(B * S, D, N)
    else:
        D = H * W
        N = C // S
        xr = jnp.transpose(x.reshape(B * S, N, D), (0, 2, 1))

    BS = B * S
    R = bases.shape[-1]
    assert bases.shape == (BS, D, R)

    # Lane-dense N: pad N to a multiple of 128.  Zero columns are fixed points
    # of the multiplicative updates (coeffT cols become exactly 0 after the
    # first update and contribute nothing to the N-reductions), so real
    # columns are unchanged.
    N_pad = max(128, ((N + 127) // 128) * 128)
    if N_pad != N:
        xr = jnp.pad(xr, ((0, 0), (0, 0), (0, N_pad - N)))

    isz = jnp.dtype(xr.dtype).itemsize
    bsz = jnp.dtype(bases.dtype).itemsize
    mm_isz = jnp.dtype(matmul_dtype).itemsize

    # Per-batch-element VMEM footprint estimate (double-buffered I/O blocks in
    # native dtype + bf16 x copy + f32 recon + coeffT state & temps).
    per_b_bytes = (
        2 * D * N_pad * isz          # double-buffered x input blocks
        + 2 * D * N_pad * isz        # double-buffered output blocks
        + 2 * D * R * bsz            # double-buffered bases input blocks
        + D * N_pad * mm_isz         # bf16 x copy held across the matmuls
        + D * N_pad * 4              # f32 reconstruction
        + 5 * R * N_pad * 4          # coeffT state + numer/denom/softmax temps
        + 2 * R * N_pad * mm_isz     # bf16 casts of coeffT
        + 10 * D * R * 4             # bases state + temps
        + 4 * R * R * 4              # btb / ctc temps
    )

    # Generation-aware budget: ~70% of physical VMEM for data, never request
    # more than ~80% as vmem_limit_bytes (leaves compiler-scratch headroom,
    # important on v7x's 64 MiB).
    capacity = _vmem_capacity_bytes()
    budget = max(8 << 20, int(0.70 * capacity))
    cap_limit = max(16 << 20, int(0.80 * capacity))

    # Bt: as many batch elements per grid step as fit, but keep >= 2 grid steps
    # whenever BS >= 2 so the "parallel" axis can shard across v7x's 2 TCs.
    max_bt_mem = max(1, budget // per_b_bytes)
    min_grid = 2 if BS >= 2 else 1
    max_bt_grid = max(1, BS // min_grid)
    Bt = int(min(BS, max_bt_mem, max_bt_grid))

    grid = int(pl.cdiv(BS, Bt))
    BS_pad = grid * Bt
    bases_in = bases
    if BS_pad != BS:
        # Zero-padded batch elements stay exactly zero through the updates.
        xr = jnp.pad(xr, ((0, BS_pad - BS), (0, 0), (0, 0)))
        bases_in = jnp.pad(bases, ((0, BS_pad - BS), (0, 0), (0, 0)))

    # TODO(synk): for shapes where per_b_bytes > budget even at Bt=1 (e.g.
    # SegNeXt-size D*N on v7x's 64 MiB VMEM) add an inner N-tiled pipeline
    # (pltpu.emit_pipeline streaming (D, Nt) x-tiles with the (R, N) coeffT
    # resident, accumulating ctc and x@coeffT across tiles).
    # TODO(synk): single-buffer the output / bases blocks (pipeline_mode=
    # pl.Buffered(1)) for extra VMEM headroom on v7x once available.
    vmem_limit = int(min(max(int(1.5 * Bt * per_b_bytes), 32 << 20), cap_limit))

    kernel = functools.partial(_hamburger_kernel, inv_t=float(inv_t),
                               n_steps=int(n_steps), mm_dtype=matmul_dtype,
                               clamp_nonneg=bool(clamp_nonneg))

    out = pl.pallas_call(
        kernel,
        out_shape=jax.ShapeDtypeStruct((BS_pad, D, N_pad), xr.dtype),
        grid_spec=pltpu.PrefetchScalarGridSpec(
            num_scalar_prefetch=0,
            grid=(grid,),
            in_specs=[
                pl.BlockSpec((Bt, D, N_pad), lambda b: (b, 0, 0)),
                pl.BlockSpec((Bt, D, R), lambda b: (b, 0, 0)),
            ],
            out_specs=pl.BlockSpec((Bt, D, N_pad), lambda b: (b, 0, 0)),
        ),
        compiler_params=pltpu.CompilerParams(
            dimension_semantics=("parallel",),
            vmem_limit_bytes=vmem_limit,
        ),
    )(xr, bases_in)

    out = out[:BS, :, :N]
    if spatial:
        return out.reshape(B, C, H, W)
    return jnp.transpose(out, (0, 2, 1)).reshape(B, C, H, W)


def build_bases(key, BS, D, R):
    """torch.rand((B*S, D, R)) followed by F.normalize(dim=1) (L2 over D)."""
    bases = jax.random.uniform(key, (BS, D, R), dtype=jnp.float32)
    norm = jnp.sqrt(jnp.sum(bases * bases, axis=1, keepdims=True))
    return bases / jnp.maximum(norm, 1e-12)


def hamburger_ref(x, bases, *, S=1, inv_t=1.0, spatial=True, n_steps=6):
    """Pure-JAX reference mirroring the PyTorch forward, for verification."""
    B, C, H, W = x.shape
    if spatial:
        D, N = C // S, H * W
        xr = x.reshape(B * S, D, N)
    else:
        D, N = H * W, C // S
        xr = jnp.transpose(x.reshape(B * S, N, D), (0, 2, 1))

    xt = jnp.transpose(xr, (0, 2, 1))

    def coeff_update(bases, coeff):
        numer = jnp.einsum("bnd,bdr->bnr", xt, bases)
        denom = jnp.einsum("bnr,brk->bnk", coeff,
                           jnp.einsum("bdr,bdk->brk", bases, bases))
        return coeff * numer / (denom + 1e-6)

    def bases_update(bases, coeff):
        numer = jnp.einsum("bdn,bnr->bdr", xr, coeff)
        denom = jnp.einsum("bdr,brk->bdk", bases,
                           jnp.einsum("bnr,bnk->brk", coeff, coeff))
        return bases * numer / (denom + 1e-6)

    coeff = jax.nn.softmax(inv_t * jnp.einsum("bnd,bdr->bnr", xt, bases), axis=-1)
    for _ in range(n_steps):
        coeff = coeff_update(bases, coeff)
        bases = bases_update(bases, coeff)
    coeff = coeff_update(bases, coeff)
    out = jnp.einsum("bdr,bnr->bdn", bases, coeff)
    if spatial:
        return out.reshape(B, C, H, W)
    return jnp.transpose(out, (0, 2, 1)).reshape(B, C, H, W)


if __name__ == "__main__":
    # Small shapes consistent with the module: B=2, C=8, H=W=16, S=1 => D=8,
    # N=256, R=32.  NMF operates on non-negative data (in the original SegNeXt
    # decode head a ReLU precedes the Hamburger NMF); signed inputs make the
    # multiplicative updates chaotic, so the demo uses a non-negative input.
    B, C, H, W = 2, 8, 16, 16
    S, R = 1, 32
    inv_t = 1.0
    n_steps = 6  # module default (training=True -> n_train_steps)

    key = jax.random.PRNGKey(0)
    kx, kb = jax.random.split(key)
    x = jax.random.uniform(kx, (B, C, H, W), dtype=jnp.float32)
    bases0 = build_bases(kb, B * S, C // S, R)

    out = hamburger_pallas(x, bases0, S=S, inv_t=inv_t, spatial=True,
                           n_steps=n_steps)
    out = jax.block_until_ready(out)

    with jax.default_matmul_precision("float32"):
        ref = hamburger_ref(x, bases0, S=S, inv_t=inv_t, spatial=True,
                            n_steps=n_steps)
        ref = jax.block_until_ready(ref)

    assert out.shape == (B, C, H, W)
    assert bool(jnp.all(jnp.isfinite(out)))
    err = float(jnp.max(jnp.abs(out - ref)))
    # Kernel matmuls use bf16 operands (f32 accumulate) across 7 multiplicative
    # NMF updates -> validate against the full-f32 reference at a matching
    # tolerance.
    assert jnp.allclose(out, ref, rtol=5e-2, atol=5e-2), f"max abs diff {err}"

    print("KERNEL_OK")
</pallas_src>

<mosaic_0001>
module attributes {stable_mosaic.version = 11 : i64} {
  func.func @_hamburger_kernel(%arg0: i32, %arg1: memref<1x8x256xf32, #tpu.memory_space<vmem>>, %arg2: memref<1x8x32xf32, #tpu.memory_space<vmem>>, %arg3: memref<1x8x256xf32, #tpu.memory_space<vmem>>) attributes {dimension_semantics = [#tpu.dimension_semantics<parallel>], iteration_bounds = array<i64: 2>, scalar_prefetch = 0 : i64, scratch_operands = 0 : i64, tpu.core_type = #tpu.core_type<tc>, window_params = [{transform_indices = @transform_0, window_bounds = array<i64: 1, 8, 256>}, {transform_indices = @transform_1, window_bounds = array<i64: 1, 8, 32>}, {transform_indices = @transform_2, window_bounds = array<i64: 1, 8, 256>}]} {
    %c0 = arith.constant 0 : index
    %c0_0 = arith.constant 0 : index
    %c0_1 = arith.constant 0 : index
    %0 = vector.load %arg1[%c0, %c0_0, %c0_1] : memref<1x8x256xf32, #tpu.memory_space<vmem>>, vector<1x8x256xf32>
    %1 = arith.truncf %0 : vector<1x8x256xf32> to vector<1x8x256xbf16>
    %c0_2 = arith.constant 0 : index
    %c0_3 = arith.constant 0 : index
    %c0_4 = arith.constant 0 : index
    %2 = vector.load %arg2[%c0_2, %c0_3, %c0_4] : memref<1x8x32xf32, #tpu.memory_space<vmem>>, vector<1x8x32xf32>
    %3 = arith.truncf %2 : vector<1x8x32xf32> to vector<1x8x32xbf16>
    "tpu.trace_start"() <{level = 10 : i32, message = "bdr,bdn->brn"}> : () -> ()
    %cst = arith.constant dense<0.000000e+00> : vector<1x32x256xf32>
    %4 = tpu.matmul %3, %1, %cst {dimension_numbers = #tpu.dot_dimension_numbers<[1], [1], [2], [2], [0, 0, 0, 2, 1, 2], [0], [0]>} : vector<1x8x32xbf16>, vector<1x8x256xbf16>, vector<1x32x256xf32> -> vector<1x32x256xf32>
    "tpu.trace_stop"() : () -> ()
    %cst_5 = arith.constant 1.000000e+00 : f32
    %5 = vector.broadcast %cst_5 : f32 to vector<1x32x256xf32>
    %6 = arith.mulf %5, %4 : vector<1x32x256xf32>
    %cst_6 = arith.constant dense<0xFF800000> : vector<1x256xf32>
    %7 = vector.multi_reduction <maximumf>, %6, %cst_6 [1] : vector<1x32x256xf32> to vector<1x256xf32>
    %8 = vector.shape_cast %7 : vector<1x256xf32> to vector<1x1x256xf32>
    %9 = vector.broadcast %8 : vector<1x1x256xf32> to vector<1x32x256xf32>
    %10 = arith.subf %6, %9 : vector<1x32x256xf32>
    %11 = math.exp %10 : vector<1x32x256xf32>
    %cst_7 = arith.constant dense<0.000000e+00> : vector<1x256xf32>
    %12 = vector.multi_reduction <add>, %11, %cst_7 [1] : vector<1x32x256xf32> to vector<1x256xf32>
    %13 = vector.shape_cast %12 : vector<1x256xf32> to vector<1x1x256xf32>
    %14 = tpu.reciprocal %13 {approx = true} : vector<1x1x256xf32> -> vector<1x1x256xf32>
    %15 = vector.broadcast %14 : vector<1x1x256xf32> to vector<1x32x256xf32>
    %16 = arith.mulf %11, %15 : vector<1x32x256xf32>
    %c0_i32 = arith.constant 0 : i32
    %c6_i32 = arith.constant 6 : i32
    %17 = arith.addi %c0_i32, %c6_i32 : i32
    %c1_i32 = arith.constant 1 : i32
    %18:2 = scf.for %arg4 = %c0_i32 to %17 step %c1_i32 iter_args(%arg5 = %2, %arg6 = %16) -> (vector<1x8x32xf32>, vector<1x32x256xf32>)  : i32 {
      %35 = arith.truncf %arg5 : vector<1x8x32xf32> to vector<1x8x32xbf16>
      "tpu.trace_start"() <{level = 10 : i32, message = "bdr,bdn->brn"}> : () -> ()
      %cst_16 = arith.constant dense<0.000000e+00> : vector<1x32x256xf32>
      %36 = tpu.matmul %35, %1, %cst_16 {dimension_numbers = #tpu.dot_dimension_numbers<[1], [1], [2], [2], [0, 0, 0, 2, 1, 2], [0], [0]>} : vector<1x8x32xbf16>, vector<1x8x256xbf16>, vector<1x32x256xf32> -> vector<1x32x256xf32>
      "tpu.trace_stop"() : () -> ()
      %37 = arith.truncf %arg5 : vector<1x8x32xf32> to vector<1x8x32xbf16>
      "tpu.trace_start"() <{level = 10 : i32, message = "bdr,bdk->brk"}> : () -> ()
      %cst_17 = arith.constant dense<0.000000e+00> : vector<1x32x32xf32>
      %38 = tpu.matmul %37, %37, %cst_17 {dimension_numbers = #tpu.dot_dimension_numbers<[1], [1], [2], [2], [0, 0, 0, 2, 1, 2], [0], [0]>} : vector<1x8x32xbf16>, vector<1x8x32xbf16>, vector<1x32x32xf32> -> vector<1x32x32xf32>
      "tpu.trace_stop"() : () -> ()
      %39 = arith.truncf %38 : vector<1x32x32xf32> to vector<1x32x32xbf16>
      %40 = arith.truncf %arg6 : vector<1x32x256xf32> to vector<1x32x256xbf16>
      "tpu.trace_start"() <{level = 10 : i32, message = "brk,bkn->brn"}> : () -> ()
      %cst_18 = arith.constant dense<0.000000e+00> : vector<1x32x256xf32>
      %41 = tpu.matmul %39, %40, %cst_18 {dimension_numbers = #tpu.dot_dimension_numbers<[2], [1], [1], [2], [0, 0, 0, 1, 1, 2], [0], [0]>} : vector<1x32x32xbf16>, vector<1x32x256xbf16>, vector<1x32x256xf32> -> vector<1x32x256xf32>
      "tpu.trace_stop"() : () -> ()
      %42 = arith.mulf %arg6, %36 : vector<1x32x256xf32>
      %cst_19 = arith.constant 9.99999997E-7 : f32
      %43 = vector.broadcast %cst_19 : f32 to vector<1x32x256xf32>
      %44 = arith.addf %41, %43 : vector<1x32x256xf32>
      %45 = tpu.reciprocal %44 {approx = true} : vector<1x32x256xf32> -> vector<1x32x256xf32>
      %46 = arith.mulf %42, %45 : vector<1x32x256xf32>
      %47 = arith.truncf %46 : vector<1x32x256xf32> to vector<1x32x256xbf16>
      "tpu.trace_start"() <{level = 10 : i32, message = "bdn,brn->bdr"}> : () -> ()
      %cst_20 = arith.constant dense<0.000000e+00> : vector<1x8x32xf32>
      %48 = tpu.matmul %1, %47, %cst_20 {dimension_numbers = #tpu.dot_dimension_numbers<[2], [2], [1], [1], [0, 0, 0, 1, 1, 1], [0], [0]>} : vector<1x8x256xbf16>, vector<1x32x256xbf16>, vector<1x8x32xf32> -> vector<1x8x32xf32>
      "tpu.trace_stop"() : () -> ()
      "tpu.trace_start"() <{level = 10 : i32, message = "brn,bkn->brk"}> : () -> ()
      %cst_21 = arith.constant dense<0.000000e+00> : vector<1x32x32xf32>
      %49 = tpu.matmul %47, %47, %cst_21 {dimension_numbers = #tpu.dot_dimension_numbers<[2], [2], [1], [1], [0, 0, 0, 1, 1, 1], [0], [0]>} : vector<1x32x256xbf16>, vector<1x32x256xbf16>, vector<1x32x32xf32> -> vector<1x32x32xf32>
      "tpu.trace_stop"() : () -> ()
      %50 = arith.truncf %arg5 : vector<1x8x32xf32> to vector<1x8x32xbf16>
      %51 = arith.truncf %49 : vector<1x32x32xf32> to vector<1x32x32xbf16>
      "tpu.trace_start"() <{level = 10 : i32, message = "bdr,brk->bdk"}> : () -> ()
      %cst_22 = arith.constant dense<0.000000e+00> : vector<1x8x32xf32>
      %52 = tpu.matmul %50, %51, %cst_22 {dimension_numbers = #tpu.dot_dimension_numbers<[2], [1], [1], [2], [0, 0, 0, 1, 1, 2], [0], [0]>} : vector<1x8x32xbf16>, vector<1x32x32xbf16>, vector<1x8x32xf32> -> vector<1x8x32xf32>
      "tpu.trace_stop"() : () -> ()
      %53 = arith.mulf %arg5, %48 : vector<1x8x32xf32>
      %cst_23 = arith.constant 9.99999997E-7 : f32
      %54 = vector.broadcast %cst_23 : f32 to vector<1x8x32xf32>
      %55 = arith.addf %52, %54 : vector<1x8x32xf32>
      %56 = tpu.reciprocal %55 {approx = true} : vector<1x8x32xf32> -> vector<1x8x32xf32>
      %57 = arith.mulf %53, %56 : vector<1x8x32xf32>
      scf.yield %57, %46 : vector<1x8x32xf32>, vector<1x32x256xf32>
    }
    %19 = arith.truncf %18#0 : vector<1x8x32xf32> to vector<1x8x32xbf16>
    "tpu.trace_start"() <{level = 10 : i32, message = "bdr,bdn->brn"}> : () -> ()
    %cst_8 = arith.constant dense<0.000000e+00> : vector<1x32x256xf32>
    %20 = tpu.matmul %19, %1, %cst_8 {dimension_numbers = #tpu.dot_dimension_numbers<[1], [1], [2], [2], [0, 0, 0, 2, 1, 2], [0], [0]>} : vector<1x8x32xbf16>, vector<1x8x256xbf16>, vector<1x32x256xf32> -> vector<1x32x256xf32>
    "tpu.trace_stop"() : () -> ()
    %21 = arith.truncf %18#0 : vector<1x8x32xf32> to vector<1x8x32xbf16>
    "tpu.trace_start"() <{level = 10 : i32, message = "bdr,bdk->brk"}> : () -> ()
    %cst_9 = arith.constant dense<0.000000e+00> : vector<1x32x32xf32>
    %22 = tpu.matmul %21, %21, %cst_9 {dimension_numbers = #tpu.dot_dimension_numbers<[1], [1], [2], [2], [0, 0, 0, 2, 1, 2], [0], [0]>} : vector<1x8x32xbf16>, vector<1x8x32xbf16>, vector<1x32x32xf32> -> vector<1x32x32xf32>
    "tpu.trace_stop"() : () -> ()
    %23 = arith.truncf %22 : vector<1x32x32xf32> to vector<1x32x32xbf16>
    %24 = arith.truncf %18#1 : vector<1x32x256xf32> to vector<1x32x256xbf16>
    "tpu.trace_start"() <{level = 10 : i32, message = "brk,bkn->brn"}> : () -> ()
    %cst_10 = arith.constant dense<0.000000e+00> : vector<1x32x256xf32>
    %25 = tpu.matmul %23, %24, %cst_10 {dimension_numbers = #tpu.dot_dimension_numbers<[2], [1], [1], [2], [0, 0, 0, 1, 1, 2], [0], [0]>} : vector<1x32x32xbf16>, vector<1x32x256xbf16>, vector<1x32x256xf32> -> vector<1x32x256xf32>
    "tpu.trace_stop"() : () -> ()
    %26 = arith.mulf %18#1, %20 : vector<1x32x256xf32>
    %cst_11 = arith.constant 9.99999997E-7 : f32
    %27 = vector.broadcast %cst_11 : f32 to vector<1x32x256xf32>
    %28 = arith.addf %25, %27 : vector<1x32x256xf32>
    %29 = tpu.reciprocal %28 {approx = true} : vector<1x32x256xf32> -> vector<1x32x256xf32>
    %30 = arith.mulf %26, %29 : vector<1x32x256xf32>
    %31 = arith.truncf %18#0 : vector<1x8x32xf32> to vector<1x8x32xbf16>
    %32 = arith.truncf %30 : vector<1x32x256xf32> to vector<1x32x256xbf16>
    "tpu.trace_start"() <{level = 10 : i32, message = "bdr,brn->bdn"}> : () -> ()
    %cst_12 = arith.constant dense<0.000000e+00> : vector<1x8x256xf32>
    %33 = tpu.matmul %31, %32, %cst_12 {dimension_numbers = #tpu.dot_dimension_numbers<[2], [1], [1], [2], [0, 0, 0, 1, 1, 2], [0], [0]>} : vector<1x8x32xbf16>, vector<1x32x256xbf16>, vector<1x8x256xf32> -> vector<1x8x256xf32>
    "tpu.trace_stop"() : () -> ()
    %c0_13 = arith.constant 0 : index
    %c0_14 = arith.constant 0 : index
    %c0_15 = arith.constant 0 : index
    %34 = vector.load %arg3[%c0_13, %c0_14, %c0_15] : memref<1x8x256xf32, #tpu.memory_space<vmem>>, vector<1x8x256xf32>
    tpu.vector_store %arg3[%c0_13, %c0_14, %c0_15], %33 {strides = array<i32>} : memref<1x8x256xf32, #tpu.memory_space<vmem>>, vector<1x8x256xf32>,
    return
  }
  func.func @transform_0(%arg0: i32) -> (i32, i32, i32) {
    %c0_i32 = arith.constant 0 : i32
    %c0_i32_0 = arith.constant 0 : i32
    %c0_i32_1 = arith.constant 0 : i32
    return %arg0, %c0_i32, %c0_i32_0 : i32, i32, i32
  }
  func.func @transform_1(%arg0: i32) -> (i32, i32, i32) {
    %c0_i32 = arith.constant 0 : i32
    %c0_i32_0 = arith.constant 0 : i32
    %c0_i32_1 = arith.constant 0 : i32
    return %arg0, %c0_i32, %c0_i32_0 : i32, i32, i32
  }
  func.func @transform_2(%arg0: i32) -> (i32, i32, i32) {
    %c0_i32 = arith.constant 0 : i32
    %c0_i32_0 = arith.constant 0 : i32
    %c0_i32_1 = arith.constant 0 : i32
    return %arg0, %c0_i32, %c0_i32_0 : i32, i32, i32
  }
}

</mosaic_0001>

<bundles_post_ra>
// kernel: tpu_custom_call.1
= control target key start
LH: loop header
LB: loop body
LE: loop exit
PB: predicated region body
PF: predicated region fallthrough
CT: control target
= control target key end

     0   :  { %7 = vsyncpa [#allocation3], 0  ;;  %s2064_s0 = inlined_call_operand.hbm [shape: f32[2,8,256], index: 0, kind: input, shape index: {}]   ;;  %s2065_s1 = inlined_call_operand.hbm [shape: f32[2,8,32], index: 1, kind: input, shape index: {}]   ;;  %s2066_s2 = inlined_call_operand.hbm [shape: f32[2,8,256], index: 2, kind: output, shape index: {}]  }
   0x1   :  { %9 = vsyncpa [#allocation3 + $0x1], 0 }
   0x2   :  { %10 = vsyncpa [#allocation6], 0 }
   0x3   :  { %12 = vsyncpa [#allocation6 + $0x1], 0 }
   0x4   :  { %13 = vsyncpa [#allocation4], 0 }
   0x5   :  { %15 = vsyncpa [#allocation4 + $0x1], 0  ;;  %s1631_s9 = smov 0   ;;  %s1633_s10 = smov 0  }
   0x6   :  { %s1635_s11 = smov 0   ;;  %s1637_s12 = smov 0  }
   0x7 LB: > { %s1652_s13 = sadd.s32 4294967295, %s1567_s12   ;;  %s1137_s14 = sadd.s32 4294967294, %s1567_s12   ;;  %s1567_s12 = sphi %s1637_s12, %s2102_s12   ;;  %s1563_s11 = sphi %s1635_s11, %s2101_s11   ;;  %s1559_s10 = sphi %s1633_s10, %s2100_s10   ;;  %s1555_s9 = sphi %s1631_s9, %s2099_s9  }
   0x8   : > { %s1656_s15 = sadd.s32 1, %s1567_s12   ;;  %s28_s16 = sadd.s32 1, %s1563_s11 }
   0x9   : > { %s25_s17 = ssub.s32 %s1567_s12, %s1656_s15  ;;  %p35_p0 = scmp.ne.s32.totalorder %s1563_s11, %s1559_s10 }
   0xa   : > { %p26_p1 = scmp.eq.s32.totalorder %s25_s17, 0  ;;  %p36_p2 = scmp.eq.s32.totalorder %s1567_s12, 0 }
   0xb   : > { %p41_p3 = scmp.ne.s32.totalorder %s1559_s10, %s1555_s9  ;;  %p42_p4 = scmp.eq.s32.totalorder %s1652_s13, 0 }
   0xc   : > { %s1668_s18 = scalar_select %p26_p1, %s1563_s11, %s28_s16  }
   0xd   : > { %p1670_p5 = por %p36_p2, %p35_p0  ;;  %p1674_p6 = por %p42_p4, %p41_p3 }
   0xe   : > { %p91_p7 = scmp.eq.s32.totalorder %s1652_s13, 1  ;;  %p97_p8 = scmp.eq.s32.totalorder %s1137_s14, 1 }
   0xf   : > { %s2070_s20 = scalar_select %p1674_p6, 1, 0 }
  0x10   : > { %p1225_p10 = scmp.lt.s32.totalorder %s1567_s12, 2  ;;  %p1681_p11 = por %p91_p7, %p35_p0 }
  0x11   : > { %p1685_p12 = por %p97_p8, %p41_p3  ;;  %s1690_s23 = sand.u32 1, %s1563_s11  }
  0x12   : > { %s2071_s21 = scalar_select %p1681_p11, 1, 0 }
  0x13   : > { %s2072_s22 = scalar_select %p1685_p12, 1, 0 }
  0x14   : > { %s1173_s24 = sshll.u32 %s1567_s12, 8  ;;  %s1140_s25 = sshll.u32 %s1690_s23, 4 }
  0x15   : > { %s1697_s28 = scalar_lea.hbm %s2064_s0, %s1173_s24  ;;  %s121_s29 = scalar_lea.vmem [#allocation2], %s1140_s25 }
  0x16   : > { %s129_s30 = sshll.u32 %s121_s29, 4  ;;  %p1701_p13 = pnand %p1225_p10, %p1670_p5  ;;  %s1705_s30 = int_to_ptr.vmem [resolvable:$true] %s129_s30 }
  0x17   : > { %s118_s4 = scalar_lea.sflag [#allocation3], %s1690_s23  ;;  %s1397_s5 = scalar_lea.hbm %s1697_s28, 256 }
  0x18   : > { %p1398_p2 = scmp.ne.s32.totalorder %s1697_s28, %s1397_s5  ;;  %p1399_p3 = pneg %p1701_p13 }
  0x19   : > { %s1402_s8 = scalar_lea.hbm %s2064_s0, 512  ;;  %p1403_p5 = scmp.lt.u32.totalorder %s1697_s28, %s2064_s0 }
  0x1a   : > { %p1400_p4 = pnand %p1399_p3, %p1398_p2  ;;  %p1404_p8 = scmp.lt.u32.totalorder %s1402_s8, %s1397_s5 }
  0x1b   : > { %p1406_p9 = scmp.lt.u32.totalorder %s1397_s5, %s1697_s28 }
  0x1c   : > { %p1401_p7 = pneg %p1400_p4  ;;  %p1405_p10 = por %p1404_p8, %p1403_p5 }
  0x1e   : > { %p1407_p0 = por %p1406_p9, %p1405_p10 }
  0x20   : > { %p1408_p1 = pnand %p1407_p0, %p1401_p7 }
  0x22   : > { %1411 = shalt.err (!%p1408_p1)
}
  0x23   : > { %s1412_s17 = scalar_lea.vmem %s1705_s30, 256  ;;  %s1609_s19 = smov [#allocation2]  }
  0x24   : > { %p1413_p2 = scmp.ne.s32.totalorder %s1705_s30, %s1412_s17  ;;  %s1417_s24 = sshll.u32 %s1609_s19, 4  ;;  %s1418_s24 = int_to_ptr.vmem [resolvable:$false] %s1417_s24 }
  0x25   : > { %s1419_s25 = scalar_lea.vmem %s1418_s24, 512  ;;  %p1420_p11 = scmp.lt.s32.totalorder %s1705_s30, %s1418_s24 }
  0x26   : > { %p1415_p4 = pnand %p1413_p2, %p1399_p3  ;;  %p1421_p5 = scmp.lt.s32.totalorder %s1419_s25, %s1412_s17 }
  0x28   : > { %p1416_p12 = pneg %p1415_p4  ;;  %p1422_p8 = por %p1421_p5, %p1420_p11 }
  0x2a   : > { %p1423_p9 = pnand %p1422_p8, %p1416_p12 }
  0x2c   : > { %1426 = shalt.err (!%p1423_p9)
}
  0x2d   : > { %1217 = dma.hbm_to_vmem [thread:$0]  (!%p1701_p13), %s1697_s28, 256, %s1705_s30, %s118_s4  }
  0x2e   : > { %p2074_p0 = scmp.lt.s32.totalorder %s1567_s12, 3  ;;  %p2075_p1 = scmp.ge.s32.totalorder %s1567_s12, 1 }
  0x2f   : > { %s1143_s27 = sshll.u32 %s1690_s23, 3  ;;  %s1144_s29 = sshll.u32 %s1567_s12, 7 }
  0x30   : > { %p1739_p7 = pnand %p2075_p1, %p2074_p0  ;;  %s1748_s7 = scalar_lea.hbm %s2065_s1, %s1144_s29 }
  0x31   : > { %s140_s8 = scalar_lea.vmem [#allocation5], %s1143_s27  ;;  %s137_s28 = scalar_lea.sflag [#allocation6], %s1690_s23 }
  0x32   : > { %s2076_s26 = scalar_select %p1739_p7, 1, 0 }
  0x33   : > { %s147_s14 = sshll.u32 %s140_s8, 4  ;;  %s1427_s30 = scalar_lea.hbm %s1748_s7, 128  ;;  %s148_s14 = int_to_ptr.vmem [resolvable:$true] %s147_s14 }
  0x34   : > { %p1428_p11 = scmp.ne.s32.totalorder %s1748_s7, %s1427_s30  ;;  %s1432_s17 = scalar_lea.hbm %s2065_s1, 256 }
  0x35   : > { %p1433_p2 = scmp.lt.u32.totalorder %s1748_s7, %s2065_s1  ;;  %p1434_p4 = scmp.lt.u32.totalorder %s1432_s17, %s1427_s30 }
  0x36   : > { %p1430_p12 = pnand %p1428_p11, %p1399_p3  ;;  %p1436_p8 = scmp.lt.u32.totalorder %s1427_s30, %s1748_s7 }
  0x37   : > { %p1435_p5 = por %p1434_p4, %p1433_p2 }
  0x38   : > { %p1431_p10 = pneg %p1430_p12 }
  0x39   : > { %p1437_p9 = por %p1436_p8, %p1435_p5 }
  0x3b   : > { %p1438_p0 = pnand %p1437_p9, %p1431_p10 }
  0x3d   : > { %1441 = shalt.err (!%p1438_p0)
}
  0x3e   : > { %s1442_s23 = scalar_lea.vmem %s148_s14, 128  ;;  %s1610_s25 = smov [#allocation5]  }
  0x3f   : > { %p1443_p1 = scmp.ne.s32.totalorder %s148_s14, %s1442_s23  ;;  %s1447_s27 = sshll.u32 %s1610_s25, 4  ;;  %s1448_s27 = int_to_ptr.vmem [resolvable:$false] %s1447_s27 }
  0x40   : > { %s1449_s29 = scalar_lea.vmem %s1448_s27, 256  ;;  %p1450_p6 = scmp.lt.s32.totalorder %s148_s14, %s1448_s27 }
  0x41   : > { %p1445_p11 = pnand %p1443_p1, %p1399_p3  ;;  %p1451_p7 = scmp.lt.s32.totalorder %s1449_s29, %s1442_s23 }
  0x43   : > { %p1446_p12 = pneg %p1445_p11  ;;  %p1452_p2 = por %p1451_p7, %p1450_p6 }
  0x45   : > { %p1453_p4 = pnand %p1452_p2, %p1446_p12 }
  0x47   : > { %1456 = shalt.err (!%p1453_p4)
}
  0x48   : > { %1220 = dma.hbm_to_vmem [thread:$0]  (!%p1701_p13), %s1748_s7, 128, %s148_s14, %s137_s28  }
  0x49   : > { %p2077_p10 = scmp.ne.s32.totalorder %s2076_s26, 0 }
  0x4a   : > { %s1773_s5 = sand.u32 (!%p2077_p10), 1, %s1559_s10   ;;  %p2078_p6 = scmp.ne.s32.totalorder (!%p2077_p10), %s2070_s20, 0 }
  0x4b   : > { %156 = sbr.rel (%p2077_p10) target bundleno = 2305 (0x901), region = 28  ;;  %s1146_s6 = sshll.u32 (!%p2077_p10), %s1773_s5, 4 }
  0x4c   : > { %s159_s8 = scalar_lea.sflag (!%p2077_p10), [#allocation3], %s1773_s5  ;;  %s162_s30 = scalar_lea.vmem (!%p2077_p10), [#allocation2], %s1146_s6 }
  0x52   : > { %1542 = dma.done.wait (%p2078_p6), %s159_s8, 256  }
  0x53   : > { %1544 = vsyncadd (%p2078_p6), %s159_s8, 4294967040  ;;  %s1147_s3 = sshll.u32 %s1773_s5, 3  ;;  %s168_s26 = scalar_lea.sflag [#allocation6], %s1773_s5 }
  0x54   : > { %s171_s7 = scalar_lea.vmem [#allocation5], %s1147_s3 }
  0x55   : > { %1546 = dma.done.wait (%p2078_p6), %s168_s26, 128  }
  0x56   : > { %1548 = vsyncadd (%p2078_p6), %s168_s26, 4294967168  ;;  %v1611_v0 = vmov 0   ;;  %v1791_v1 = vld [vmem:[%s171_s7] sm:$0xff]   ;;  %v199_v2 = vld [vmem:[%s162_s30 + $0x8] sm:$0xff]  ;;  %vm227_vm0 = vcmask 1043456   ;;  %vm220_vm1 = vcmask 64512  }
  0x57   : > { %266 = vmatprep.mubr.bf16.mxu0 %v1611_v0  ;;  %276 = vmatprep.mubr.bf16.mxu1 %v1611_v0  ;;  %v198_v3 = vld [vmem:[%s162_s30] sm:$0xff]  ;;  %v203_v4 = vpack.c.bf16 %v1791_v1, %v1791_v1  ;;  %v1795_v5 = vpack.c.bf16 %v199_v2, %v199_v2  ;;  %s1813_s20 = scalar_lea.vmem [#allocation7], %s1146_s6  ;;  %s1834_s14 = smov 0  }
  0x58   : > { %v1797_v6 = vpack.c.bf16 %v198_v3, %v198_v3 }
  0x59   : > { %204 = vxpose.xlu0.c.b16.start.end [1/1] (short) (narrow) %v203_v4, 32  ;;  %1149 = vmatprep.subr.msk.bf16.mxu0 %vm227_vm0, %v1795_v5 }
  0x5a   : > { %v1803_v7 = vsel %vm227_vm0, %v1797_v6, 0  ;;  %1204 = vmatprep.subr.msk.bf16.mxu1 %vm227_vm0, %v1795_v5 }
  0x5b   : > { %235 = vmatpush1.bf16.msra.mxu0 %v1803_v7  ;;  %1205 = vmatpush1.bf16.msra.mxu1 %v1803_v7 }
  0xbf   : > { %v212_v8 = vpop.trf.xlu0 }
  0xc0   : > { %1150 = vmatmul.mubr.msk.bf16.vlgmr.msra.gmra.mrb[0].mxu0 %vm220_vm1, %v212_v8 }
  0xc3   : > { %v213_v9 = vpop.trf.xlu0 }
  0xc4   : > { %1151 = vmatmul.mubr.msk.bf16.vlgmr.msra.gmra.mrb[0].mxu1 %vm220_vm1, %v213_v9 }
 0x193   : > { %v268_v10 = vpop.f32.mrb[0].mxu0 }
 0x194   : > { %v270_v11 = vpop.f32.mrb[1].mxu0 }
 0x195   : > { %v272_v12 = vpop.f32.mrb[2].mxu0 }
 0x196   : > { %v274_v13 = vpop.f32.mrb[3].mxu0 }
 0x197   : > { %v278_v14 = vpop.f32.mrb[0].mxu1 }
 0x198   : > { %v287_v15 = vmax.f32 %v268_v10, %v278_v14  ;;  %v280_v16 = vpop.f32.mrb[1].mxu1 }
 0x199   : > { %v296_v17 = vmax.f32 %v270_v11, %v280_v16  ;;  %v282_v18 = vpop.f32.mrb[2].mxu1 }
 0x19a   : > { %v288_v19 = vmax.f32 %v272_v12, %v282_v18  ;;  %v284_v20 = vpop.f32.mrb[3].mxu1 }
 0x19b   : > { %v297_v21 = vmax.f32 %v274_v13, %v284_v20 }
 0x19c   : > { %v289_v22 = vmax.f32 %v287_v15, %v288_v19 }
 0x19d   : > { %v298_v23 = vmax.f32 %v296_v17, %v297_v21 }
 0x19e   : > { %v290_v24 = vrot.slane %v289_v22, 4 }
 0x19f   : > { %v299_v25 = vrot.slane %v298_v23, 4 }
 0x1a0   : > { %v291_v26 = vmax.f32 %v289_v22, %v290_v24 }
 0x1a1   : > { %v300_v27 = vmax.f32 %v298_v23, %v299_v25 }
 0x1a2   : > { %v292_v28 = vrot.slane %v291_v26, 2 }
 0x1a3   : > { %v301_v29 = vrot.slane %v300_v27, 2 }
 0x1a4   : > { %v293_v30 = vmax.f32 %v291_v26, %v292_v28 }
 0x1a5   : > { %v302_v31 = vmax.f32 %v300_v27, %v301_v29 }
 0x1a6   : > { %v294_v32 = vrot.slane %v293_v30, 1 }
 0x1a7   : > { %v303_v33 = vrot.slane %v302_v31, 1 }
 0x1a8   : > { %v295_v34 = vmax.f32 %v293_v30, %v294_v32 }
 0x1a9   : > { %v304_v35 = vmax.f32 %v302_v31, %v303_v33 }
 0x1aa   : > { %v305_v36 = vsub.f32 %v268_v10, %v295_v34  ;;  %v307_v37 = vsub.f32 %v272_v12, %v295_v34  ;;  %v309_v38 = vsub.f32 %v278_v14, %v295_v34  ;;  %v311_v39 = vsub.f32 %v282_v18, %v295_v34 }
 0x1ab   : > { %v306_v40 = vsub.f32 %v270_v11, %v304_v35  ;;  %v308_v41 = vsub.f32 %v274_v13, %v304_v35  ;;  %v310_v42 = vsub.f32 %v280_v16, %v304_v35  ;;  %v312_v43 = vsub.f32 %v284_v20, %v304_v35 }
 0x1ac   : > { %v313_v44 = vmul.f32 1.442695, %v305_v36  ;;  %v317_v45 = vmul.f32 1.442695, %v307_v37  ;;  %v321_v46 = vmul.f32 1.442695, %v309_v38 }
 0x1ad   : > { %v325_v47 = vmul.f32 1.442695, %v311_v39  ;;  %v315_v48 = vmul.f32 1.442695, %v306_v40  ;;  %v319_v49 = vmul.f32 1.442695, %v308_v41 }
 0x1ae   : > { %1343 = vpow2.f32 %v313_v44  ;;  %v323_v50 = vmul.f32 1.442695, %v310_v42  ;;  %v327_v51 = vmul.f32 1.442695, %v312_v43 }
 0x1af   : > { %1345 = vpow2.f32 %v317_v45 }
 0x1b0   : > { %1347 = vpow2.f32 %v321_v46 }
 0x1b1   : > { %1349 = vpow2.f32 %v325_v47 }
 0x1b2   : > { %1351 = vpow2.f32 %v315_v48 }
 0x1b3   : > { %1353 = vpow2.f32 %v319_v49 }
 0x1b4   : > { %1355 = vpow2.f32 %v323_v50 }
 0x1b5   : > { %1357 = vpow2.f32 %v327_v51 }
 0x1b8   : > { %v1344_v52 = vpop.eup %1343 }
 0x1b9   : > { %v1346_v53 = vpop.eup %1345 }
 0x1ba   : > { %v1348_v54 = vpop.eup %1347  ;;  %v329_v55 = vadd.f32 %v1346_v53, %v1344_v52 }
 0x1bb   : > { %v1350_v56 = vpop.eup %1349 }
 0x1bc   : > { %v1352_v57 = vpop.eup %1351  ;;  %v330_v58 = vadd.f32 %v1348_v54, %v329_v55 }
 0x1bd   : > { %v1354_v59 = vpop.eup %1353 }
 0x1be   : > { %v331_v60 = vadd.f32 %v1350_v56, %v330_v58  ;;  %v338_v61 = vadd.f32 %v1354_v59, %v1352_v57  ;;  %v1356_v62 = vpop.eup %1355 }
 0x1bf   : > { %v1358_v3 = vpop.eup %1357 }
 0x1c0   : > { %v332_v63 = vrot.slane %v331_v60, 4  ;;  %v339_v2 = vadd.f32 %v1356_v62, %v338_v61 }
 0x1c2   : > { %v333_v4 = vadd.f32 %v332_v63, %v331_v60  ;;  %v340_v8 = vadd.f32 %v1358_v3, %v339_v2 }
 0x1c4   : > { %v334_v9 = vrot.slane %v333_v4, 2  ;;  %v341_v10 = vrot.slane %v340_v8, 4 }
 0x1c6   : > { %v335_v11 = vadd.f32 %v334_v9, %v333_v4  ;;  %v342_v12 = vadd.f32 %v341_v10, %v340_v8 }
 0x1c8   : > { %v336_v13 = vrot.slane %v335_v11, 1  ;;  %v343_v14 = vrot.slane %v342_v12, 2 }
 0x1ca   : > { %v337_v15 = vadd.f32 %v336_v13, %v335_v11  ;;  %v344_v16 = vadd.f32 %v343_v14, %v342_v12 }
 0x1cc   : > { %1359 = vrcp.f32 %v337_v15  ;;  %v345_v17 = vrot.slane %v344_v16, 1 }
 0x1ce   : > { %v346_v18 = vadd.f32 %v345_v17, %v344_v16 }
 0x1d0   : > { %1361 = vrcp.f32 %v346_v18 }
 0x1d6   : > { %v1360_v19 = vpop.eup %1359 }
 0x1d7   : > { %v349_v20 = vmul.f32 %v1360_v19, %v1344_v52   ;;  %v351_v21 = vmul.f32 %v1360_v19, %v1346_v53   ;;  %v353_v22 = vmul.f32 %v1360_v19, %v1348_v54   ;;  %v355_v23 = vmul.f32 %v1360_v19, %v1350_v56  }
 0x1da   : > { %v1362_v24 = vpop.eup %1361 }
 0x1db   : > { %v350_v25 = vmul.f32 %v1362_v24, %v1352_v57   ;;  %v352_v26 = vmul.f32 %v1362_v24, %v1354_v59   ;;  %v354_v27 = vmul.f32 %v1362_v24, %v1356_v62   ;;  %v356_v28 = vmul.f32 %v1362_v24, %v1358_v3  }
 0x1dc LB: >> { %1152 = vmatprep.subr.msk.bf16.mxu0 %vm227_vm0, %v1795_v5  ;;  %v1612_v29 = vmov 0   ;;  %v1871_v30 = vpack.c.bf16 %v1603_v1, %v1603_v1  ;;  %v503_v34 = vpack.c.bf16 %v1587_v26, %v1595_v25  ;;  %v502_v35 = vpack.c.bf16 %v1591_v21, %v1599_v20  ;;  %s362_s14 = sadd.s32 1, %s1607_s14   ;;  %s1607_s14 = sphi %s1834_s14, %s362_s14   ;;  %v1603_v1 = vphi %v1791_v1, %v2095_v1   ;;  %v1599_v20 = vphi %v349_v20, %v2094_v20   ;;  %v1595_v25 = vphi %v350_v25, %v2093_v25   ;;  %v1591_v21 = vphi %v351_v21, %v2092_v21   ;;  %v1587_v26 = vphi %v352_v26, %v2091_v26   ;;  %v1583_v22 = vphi %v353_v22, %v2090_v22   ;;  %v1579_v27 = vphi %v354_v27, %v2089_v27   ;;  %v1575_v23 = vphi %v355_v23, %v2088_v23   ;;  %v1571_v28 = vphi %v356_v28, %v2087_v28  }
 0x1dd   : >> { %396 = vmatpush1.bf16.msra.mxu0 %v1803_v7  ;;  %427 = vmatprep.mubr.bf16.mxu0 %v1612_v29  ;;  %v505_v36 = vpack.c.bf16 %v1571_v28, %v1579_v27  ;;  %v504_v37 = vpack.c.bf16 %v1575_v23, %v1583_v22  ;;  %vm514_vm2 = vcmask 261120   ;;  %vm1614_vm3 = vmmov 0   ;;  %p359_p13 = scmp.ge.s32.totalorder %s362_s14, 6  }
 0x1de   : >> { %373 = vxpose.xlu0.c.b16.start.end [1/1] (short) (narrow) %v1871_v30, 32  ;;  %1206 = vmatprep.subr.msk.bf16.mxu1 %vm227_vm0, %v1871_v30  ;;  %v449_v31 = vsel %vm227_vm0, %v1871_v30, 0  ;;  %s1174_s28 = sshll.u32 (%p359_p13), %s1652_s13, 8  ;;  %s1012_s4 = sshll.u32 (%p359_p13), %s1813_s20, 4  ;;  %s2020_s4 = int_to_ptr.vmem [resolvable:$true] %s1012_s4 }
 0x1df   : >> { %1185 = vmatpush3.bf16.msra.mxu1 %v449_v31  ;;  %s2018_s19 = scalar_lea.hbm (%p359_p13), %s2066_s2, %s1174_s28  ;;  %s998_s24 = scalar_lea.sflag (%p359_p13), [#allocation4], %s1773_s5 }
 0x1e0   : >> { %521 = vmatprep.subr.bf16.mxu1 %v503_v34  ;;  %s1457_s23 = scalar_lea.vmem (%p359_p13), %s2020_s4, 256  ;;  %p2096_p7 = scmp.ne.s32.totalorder (%p359_p13), %s2071_s21, 0 }
 0x1e1   : > { %p1458_p3 = scmp.ne.s32.totalorder (%p359_p13), %s2020_s4, %s1457_s23  ;;  %s1615_s13 = smov (%p359_p13), [#allocation7]  }
 0x1e2   : > { %s1461_s25 = sshll.u32 (%p359_p13), %s1615_s13, 4  ;;  %s1462_s25 = int_to_ptr.vmem [resolvable:$false] %s1461_s25 }
 0x1e3   : > { %p1459_p5 = pnand (%p359_p13), %p1458_p3, %p2096_p7  ;;  %s1463_s27 = scalar_lea.vmem (%p359_p13), %s1462_s25, 512 }
 0x1e4   : > { %p1464_p9 = scmp.lt.s32.totalorder (%p359_p13), %s2020_s4, %s1462_s25  ;;  %p1465_p0 = scmp.lt.s32.totalorder (%p359_p13), %s1463_s27, %s1457_s23 }
 0x1e5   : > { %p1460_p8 = pneg (%p359_p13), %p1459_p5 }
 0x1e6   : > { %p1466_p1 = por (%p359_p13), %p1465_p0, %p1464_p9 }
 0x1e8   : > { %p1467_p11 = pnand (%p359_p13), %p1466_p1, %p1460_p8 }
 0x244   : >> { %v381_v32 = vpop.trf.xlu0 }
 0x245   : >> { %1153 = vmatmul.mubr.msk.bf16.vlgmr.msra.gmra.mrb[0].mxu0 %vm220_vm1, %v381_v32  ;;  %1186 = vmatprep.mubr.msk.bf16.mxu1 %vm220_vm1, %v381_v32 }
 0x246   : >> { %437 = vmatprep.mubr.bf16.mxu0 %v1612_v29 }
 0x248   : >> { %v382_v33 = vpop.trf.xlu0 }
 0x249   : >> { %1187 = vmatmul.mubr.msk.bf16.vlgmr.msra.gmra.mrb[0].mxu1 %vm220_vm1, %v382_v33 }
 0x24a   : >> { %553 = vmatprep.mubr.bf16.mxu1 %v1612_v29  ;;  %522 = vmatpush1.bf16.msra.mxu1 %v502_v35 }
 0x24b   : >> { %523 = vmatprep.subr.bf16.mxu1 %v505_v36 }
 0x24d   : >> { %1154 = vmatmul.mubr.msk.bf16.gmra.mrb[4].mxu0 %vm220_vm1, %v382_v33 }
 0x24e   : >> { %626 = vmatprep.mubr.bf16.mxu0 %v1795_v5  ;;  %524 = vmatpush1.bf16.msra.mxu1 %v504_v37 }
 0x318   : >> { %v429_v38 = vpop.f32.mrb[0].mxu0 }
 0x319   : >> { %v431_v39 = vpop.f32.mrb[1].mxu0  ;;  %v506_v8 = vmul.f32 %v1599_v20, %v429_v38 }
 0x31a   : >> { %v433_v40 = vpop.f32.mrb[2].mxu0  ;;  %v507_v11 = vmul.f32 %v1595_v25, %v431_v39 }
 0x31b   : >> { %v435_v41 = vpop.f32.mrb[3].mxu0  ;;  %v508_v13 = vmul.f32 %v1591_v21, %v433_v40 }
 0x31c   : >> { %v1188_v42 = vpop.f32.mrb[0].mxu1  ;;  %v509_v16 = vmul.f32 %v1587_v26, %v435_v41 }
 0x31d   : >> { %v485_v43 = vpop.f32.mrb[1].mxu1 }
 0x31e   : >> { %v1189_v44 = vpop.f32.mrb[2].mxu1 }
 0x31f   : >> { %v501_v45 = vpack.c.bf16 %v1189_v44, %v1188_v42  ;;  %v488_v46 = vpop.f32.mrb[3].mxu1 }
 0x320   : >> { %v500_v47 = vpack.c.bf16 %v488_v46, %v485_v43  ;;  %v439_v48 = vpop.f32.mrb[4].mxu0 }
 0x321   : >> { %v441_v49 = vpop.f32.mrb[5].mxu0 }
 0x322   : >> { %v443_v50 = vpop.f32.mrb[6].mxu0  ;;  %1157 = vmatmul.mubr.msk.bf16.vlgmr.msra.gmra.mrb[4].mxu1 %vm514_vm2, %v500_v47  ;;  %v511_v33 = vmul.f32 %v1579_v27, %v441_v49 }
 0x323   : >> { %v445_v51 = vpop.f32.mrb[7].mxu0  ;;  %563 = vmatprep.mubr.bf16.mxu1 %v1612_v29 }
 0x324   : >> { %v513_v35 = vmul.f32 %v1571_v28, %v445_v51 }
 0x32a   : >> { %1158 = vmatmul.mubr.msk.bf16.gmra.mrb[8].mxu1 %vm514_vm2, %v501_v45 }
 0x3f5   : >> { %v555_v52 = vpop.f32.mrb[4].mxu1 }
 0x3f6   : >> { %v556_v53 = vadd.f32 1e-06, %v555_v52  ;;  %v557_v54 = vpop.f32.mrb[5].mxu1 }
 0x3f7   : >> { %v558_v55 = vadd.f32 1e-06, %v557_v54  ;;  %v559_v56 = vpop.f32.mrb[6].mxu1 }
 0x3f8   : >> { %1363 = vrcp.f32 %v556_v53  ;;  %v560_v57 = vadd.f32 1e-06, %v559_v56  ;;  %v561_v58 = vpop.f32.mrb[7].mxu1 }
 0x3f9   : >> { %1365 = vrcp.f32 %v558_v55  ;;  %v562_v59 = vadd.f32 1e-06, %v561_v58 }
 0x3fa   : >> { %1367 = vrcp.f32 %v560_v57 }
 0x3fb   : >> { %1369 = vrcp.f32 %v562_v59 }
 0x3fd   : >> { %v565_v60 = vpop.f32.mrb[8].mxu1 }
 0x3fe   : >> { %v566_v61 = vadd.f32 1e-06, %v565_v60  ;;  %v567_v62 = vpop.f32.mrb[9].mxu1 }
 0x3ff   : >> { %v568_v63 = vadd.f32 1e-06, %v567_v62  ;;  %v569_v2 = vpop.f32.mrb[10].mxu1 }
 0x400   : >> { %1371 = vrcp.f32 %v566_v61  ;;  %v570_v3 = vadd.f32 1e-06, %v569_v2  ;;  %v571_v4 = vpop.f32.mrb[11].mxu1 }
 0x401   : >> { %1373 = vrcp.f32 %v568_v63  ;;  %v572_v9 = vadd.f32 1e-06, %v571_v4 }
 0x402   : >> { %v1364_v10 = vpop.eup %1363  ;;  %1375 = vrcp.f32 %v570_v3 }
 0x403   : >> { %v1366_v12 = vpop.eup %1365  ;;  %1377 = vrcp.f32 %v572_v9  ;;  %v1896_v20 = vmul.f32 %v1364_v10, %v506_v8  }
 0x404   : >> { %v1368_v15 = vpop.eup %1367  ;;  %v1899_v25 = vmul.f32 %v1366_v12, %v507_v11  }
 0x405   : >> { %v2079_v14 = vmov %v1896_v20  ;;  %v1370_v18 = vpop.eup %1369  ;;  %v1901_v21 = vmul.f32 %v1368_v15, %v508_v13   ;;  %v510_v20 = vmul.f32 %v1583_v22, %v439_v48 }
 0x406   : >> { %v2080_v17 = vmov %v1899_v25  ;;  %v1903_v26 = vmul.f32 %v1370_v18, %v509_v16   ;;  %v512_v25 = vmul.f32 %v1575_v23, %v443_v50 }
 0x407   : >> { %v2081_v19 = vmov %v1901_v21 }
 0x408   : >> { %v2082_v24 = vmov %v1903_v26  ;;  %v1907_v29 = vpack.c.bf16 %v2081_v19, %v2079_v14 }
 0x409   : >> { %v1911_v31 = vpack.c.bf16 %v2082_v24, %v2080_v17 }
 0x40a   : >> { %v1372_v32 = vpop.eup %1371 }
 0x40b   : >> { %594 = vmatprep.subr.bf16.mxu0 %v1911_v31  ;;  %634 = vmatprep.subr.bf16.mxu1 %v1911_v31  ;;  %v1374_v21 = vpop.eup %1373  ;;  %v1920_v22 = vmul.f32 %v1372_v32, %v510_v20   ;;  %v2094_v20 = vmov %v2079_v14 }
 0x40c   : >> { %666 = vmatprep.mubr.bf16.mxu1 %v1911_v31  ;;  %595 = vmatpush1.bf16.xpose.msra.mxu0 %v1907_v29  ;;  %v1376_v26 = vpop.eup %1375  ;;  %v1924_v27 = vmul.f32 %v1374_v21, %v511_v33   ;;  %v2092_v21 = vmov %v2081_v19 }
 0x40d   : >> { %v2083_v34 = vmov %v1920_v22  ;;  %635 = vmatpush1.bf16.xpose.msra.mxu1 %v1907_v29  ;;  %v1378_v37 = vpop.eup %1377  ;;  %v1926_v23 = vmul.f32 %v1376_v26, %v512_v25   ;;  %v1613_v22 = vmov 0.0   ;;  %v2091_v26 = vmov %v2082_v24 }
 0x40e   : >> { %v2084_v36 = vmov %v1924_v27  ;;  %v1928_v28 = vmul.f32 %v1378_v37, %v513_v35   ;;  %v2093_v25 = vmov %v2080_v17 }
 0x40f   : >> { %v2085_v38 = vmov %v1926_v23 }
 0x410   : >> { %v2086_v39 = vmov %v1928_v28  ;;  %v1932_v40 = vpack.c.bf16 %v2085_v38, %v2083_v34 }
 0x411   : >> { %v1936_v41 = vpack.c.bf16 %v2086_v39, %v2084_v36 }
 0x413   : >> { %596 = vmatprep.subr.bf16.mxu0 %v1936_v41  ;;  %636 = vmatprep.subr.bf16.mxu1 %v1936_v41 }
 0x414   : >> { %597 = vmatpush1.bf16.xpose.msra.mxu0 %v1932_v40 }
 0x415   : >> { %637 = vmatpush1.bf16.xpose.msra.mxu1 %v1932_v40  ;;  %1190 = vmatprep.subr.bf16.mxu0 %v1613_v22 }
 0x41b   : >> { %627 = vmatmul.mubr.bf16.vlgmr.msra.gmra.mrb[8].mxu0 %v1797_v6 }
 0x41c   : >> { %667 = vmatmul.mubr.bf16.vlgmr.msra.gmra.mrb[12].mxu1 %v1907_v29  ;;  %1194 = vmatprep.mubr.msk.bf16.mxu0 %vm1614_vm3, %v1613_v22 }
 0x41d   : >> { %674 = vmatprep.mubr.bf16.mxu1 %v1936_v41 }
 0x424   : >> { %675 = vmatmul.mubr.bf16.gmra.mrb[16].mxu1 %v1932_v40 }
 0x4ee   : >> { %v628_v23 = vpop.f32.mrb[8].mxu0 }
 0x4ef   : >> { %v668_v27 = vpop.f32.mrb[12].mxu1  ;;  %v630_v28 = vpop.f32.mrb[9].mxu0  ;;  %v685_v58 = vmul.f32 %v1603_v1, %v628_v23  ;;  %v2088_v23 = vmov %v2085_v38 }
 0x4f0   : >> { %v670_v42 = vpop.f32.mrb[13].mxu1  ;;  %v631_v43 = vpop.f32.mrb[10].mxu0  ;;  %v2087_v28 = vmov %v2086_v39 }
 0x4f1   : >> { %v671_v44 = vpop.f32.mrb[14].mxu1  ;;  %v632_v45 = vpop.f32.mrb[11].mxu0 }
 0x4f2   : >> { %v683_v46 = vpack.c.bf16 %v671_v44, %v668_v27  ;;  %v673_v47 = vpop.f32.mrb[15].mxu1  ;;  %v2089_v27 = vmov %v2084_v36 }
 0x4f4   : >> { %1191 = vmatpush3.bf16.msra.mxu0 %v683_v46 }
 0x4f5   : >> { %1192 = vmatprep.subr.bf16.mxu0 %v1613_v22  ;;  %v2090_v22 = vmov %v2083_v34 }
 0x4f7   : >> { %v676_v48 = vpop.f32.mrb[16].mxu1 }
 0x4f8   : >> { %v678_v49 = vpop.f32.mrb[17].mxu1 }
 0x4f9   : >> { %v679_v50 = vpop.f32.mrb[18].mxu1 }
 0x4fa   : >> { %v684_v51 = vpack.c.bf16 %v679_v50, %v676_v48  ;;  %v681_v52 = vpop.f32.mrb[19].mxu1 }
 0x4fc   : >> { %1193 = vmatpush3.bf16.msra.mxu0 %v684_v51 }
 0x4fd   : > { %1160 = vmatprep.subr.msk.bf16.mxu0 (%p359_p13), %vm227_vm0, %v1795_v5 }
 0x4ff   : >> { %1195 = vmatmul.mubr.msk.bf16.vlgmr.msra.gmra.mrb[12].mxu0 %vm514_vm2, %v1871_v30 }
 0x500   : > { %785 = vmatprep.mubr.bf16.mxu0 (%p359_p13), %v1611_v0  ;;  %754 = vmatpush1.bf16.msra.mxu0 (%p359_p13), %v1803_v7 }
 0x5d2   : >> { %v722_v53 = vpop.f32.mrb[12].mxu0 }
 0x5d3   : >> { %v723_v54 = vadd.f32 1e-06, %v722_v53  ;;  %v1196_v55 = vpop.f32.mrb[13].mxu0 }
 0x5d4   : >> { %v725_v56 = vpop.f32.mrb[14].mxu0 }
 0x5d5   : >> { %1379 = vrcp.f32 %v723_v54  ;;  %v1197_v57 = vpop.f32.mrb[15].mxu0 }
 0x5dc   : > { %361 = sbr.rel (!%p359_p13) target bundleno = 476 (0x1dc), region = 93 }
 0x5df   : >> { %v1380_v59 = vpop.eup %1379 }
 0x5e0   : >> { %v729_v60 = vmul.f32 %v1380_v59, %v685_v58  }
 0x5e2   : >> { %v2095_v1 = vmov %v729_v60 }
 0x5e3   : > { %v1978_v1 = vpack.c.bf16 %v729_v60, %v729_v60 }
 0x5e5   : > { %731 = vxpose.xlu0.c.b16.start.end [1/1] (short) (narrow) %v1978_v1, 32  ;;  %1207 = vmatprep.subr.msk.bf16.mxu1 %vm227_vm0, %v1978_v1  ;;  %v807_v30 = vsel %vm227_vm0, %v1978_v1, 0 }
 0x5e6   : > { %1199 = vmatpush3.bf16.msra.mxu1 %v807_v30 }
 0x5e7   : > { %879 = vmatprep.subr.bf16.mxu1 %v1911_v31 }
 0x64b   : > { %v739_v6 = vpop.trf.xlu0 }
 0x64c   : > { %1161 = vmatmul.mubr.msk.bf16.vlgmr.msra.gmra.mrb[0].mxu0 %vm220_vm1, %v739_v6  ;;  %1200 = vmatprep.mubr.msk.bf16.mxu1 %vm220_vm1, %v739_v6 }
 0x64d   : > { %795 = vmatprep.mubr.bf16.mxu0 %v1611_v0 }
 0x64f   : > { %v740_v5 = vpop.trf.xlu0 }
 0x650   : > { %1201 = vmatmul.mubr.msk.bf16.vlgmr.msra.gmra.mrb[0].mxu1 %vm220_vm1, %v740_v5 }
 0x651   : > { %880 = vmatpush1.bf16.msra.mxu1 %v1907_v29  ;;  %911 = vmatprep.mubr.bf16.mxu1 %v1611_v0 }
 0x652   : > { %881 = vmatprep.subr.bf16.mxu1 %v1936_v41 }
 0x654   : > { %1162 = vmatmul.mubr.msk.bf16.gmra.mrb[4].mxu0 %vm220_vm1, %v740_v5 }
 0x655   : > { %882 = vmatpush1.bf16.msra.mxu1 %v1932_v40  ;;  %986 = vmatprep.mubr.bf16.mxu0 %v1611_v0 }
 0x71f   : > { %v787_v7 = vpop.f32.mrb[0].mxu0 }
 0x720   : > { %v789_v61 = vpop.f32.mrb[1].mxu0  ;;  %v864_v22 = vmul.f32 %v787_v7, %v2079_v14 }
 0x721   : > { %v791_v62 = vpop.f32.mrb[2].mxu0  ;;  %v865_v28 = vmul.f32 %v789_v61, %v2080_v17 }
 0x722   : > { %v793_v63 = vpop.f32.mrb[3].mxu0  ;;  %v866_v43 = vmul.f32 %v791_v62, %v2081_v19 }
 0x723   : > { %v1202_v2 = vpop.f32.mrb[0].mxu1  ;;  %v867_v46 = vmul.f32 %v793_v63, %v2082_v24 }
 0x724   : > { %v843_v3 = vpop.f32.mrb[1].mxu1 }
 0x725   : > { %v1203_v4 = vpop.f32.mrb[2].mxu1 }
 0x726   : > { %v859_v8 = vpack.c.bf16 %v1203_v4, %v1202_v2  ;;  %v846_v9 = vpop.f32.mrb[3].mxu1 }
 0x727   : > { %v858_v10 = vpack.c.bf16 %v846_v9, %v843_v3  ;;  %v797_v11 = vpop.f32.mrb[4].mxu0 }
 0x728   : > { %v799_v12 = vpop.f32.mrb[5].mxu0  ;;  %v868_v52 = vmul.f32 %v797_v11, %v2083_v34 }
 0x729   : > { %v801_v13 = vpop.f32.mrb[6].mxu0  ;;  %1165 = vmatmul.mubr.msk.bf16.vlgmr.msra.gmra.mrb[4].mxu1 %vm514_vm2, %v858_v10  ;;  %v869_v17 = vmul.f32 %v799_v12, %v2084_v36 }
 0x72a   : > { %v803_v15 = vpop.f32.mrb[7].mxu0  ;;  %921 = vmatprep.mubr.bf16.mxu1 %v1611_v0  ;;  %v870_v19 = vmul.f32 %v801_v13, %v2085_v38 }
 0x72b   : > { %v871_v56 = vmul.f32 %v803_v15, %v2086_v39 }
 0x731   : > { %1166 = vmatmul.mubr.msk.bf16.gmra.mrb[8].mxu1 %vm514_vm2, %v859_v8 }
 0x7fc   : > { %v913_v16 = vpop.f32.mrb[4].mxu1 }
 0x7fd   : > { %v914_v18 = vadd.f32 1e-06, %v913_v16  ;;  %v915_v29 = vpop.f32.mrb[5].mxu1 }
 0x7fe   : > { %v916_v31 = vadd.f32 1e-06, %v915_v29  ;;  %v917_v20 = vpop.f32.mrb[6].mxu1 }
 0x7ff   : > { %1381 = vrcp.f32 %v914_v18  ;;  %v918_v32 = vadd.f32 1e-06, %v917_v20  ;;  %v919_v33 = vpop.f32.mrb[7].mxu1 }
 0x800   : > { %1383 = vrcp.f32 %v916_v31  ;;  %v920_v21 = vadd.f32 1e-06, %v919_v33 }
 0x801   : > { %1385 = vrcp.f32 %v918_v32 }
 0x802   : > { %1387 = vrcp.f32 %v920_v21 }
 0x804   : > { %v923_v25 = vpop.f32.mrb[8].mxu1 }
 0x805   : > { %v924_v26 = vadd.f32 1e-06, %v923_v25  ;;  %v925_v35 = vpop.f32.mrb[9].mxu1 }
 0x806   : > { %v926_v37 = vadd.f32 1e-06, %v925_v35  ;;  %v927_v40 = vpop.f32.mrb[10].mxu1 }
 0x807   : > { %1389 = vrcp.f32 %v924_v26  ;;  %v928_v0 = vadd.f32 1e-06, %v927_v40  ;;  %v929_v41 = vpop.f32.mrb[11].mxu1 }
 0x808   : > { %1391 = vrcp.f32 %v926_v37  ;;  %v930_v23 = vadd.f32 1e-06, %v929_v41 }
 0x809   : > { %v1382_v27 = vpop.eup %1381  ;;  %1393 = vrcp.f32 %v928_v0 }
 0x80a   : > { %v1384_v42 = vpop.eup %1383  ;;  %1395 = vrcp.f32 %v930_v23  ;;  %v940_v44 = vmul.f32 %v1382_v27, %v864_v22 }
 0x80b   : > { %v1386_v45 = vpop.eup %1385  ;;  %v941_v47 = vmul.f32 %v1384_v42, %v865_v28 }
 0x80c   : > { %v1388_v48 = vpop.eup %1387  ;;  %v942_v49 = vmul.f32 %v1386_v45, %v866_v43 }
 0x80d   : > { %v943_v50 = vmul.f32 %v1388_v48, %v867_v46 }
 0x80e   : > { %v948_v51 = vpack.c.bf16 %v942_v49, %v940_v44 }
 0x80f   : > { %v949_v14 = vpack.c.bf16 %v943_v50, %v941_v47 }
 0x811   : > { %v1390_v53 = vpop.eup %1389  ;;  %954 = vmatprep.subr.bf16.mxu0 %v949_v14 }
 0x812   : > { %v1392_v54 = vpop.eup %1391  ;;  %955 = vmatpush1.bf16.msra.mxu0 %v948_v51  ;;  %v944_v55 = vmul.f32 %v1390_v53, %v868_v52 }
 0x813   : > { %v1394_v24 = vpop.eup %1393  ;;  %v945_v57 = vmul.f32 %v1392_v54, %v869_v17 }
 0x814   : > { %v1396_v58 = vpop.eup %1395  ;;  %v946_v59 = vmul.f32 %v1394_v24, %v870_v19 }
 0x815   : > { %v947_v34 = vmul.f32 %v1396_v58, %v871_v56 }
 0x816   : > { %v950_v60 = vpack.c.bf16 %v946_v59, %v944_v55 }
 0x817   : > { %v951_v36 = vpack.c.bf16 %v947_v34, %v945_v57 }
 0x819   : > { %956 = vmatprep.subr.bf16.mxu0 %v951_v36 }
 0x81a   : > { %957 = vmatpush1.bf16.msra.mxu0 %v950_v60 }
 0x81d   : > { %1167 = vmatmul.mubr.msk.bf16.vlgmr.msra.gmra.mrb[8].mxu0 %vm514_vm2, %v1978_v1 }
 0x8f0   : > { %v988_v38 = vpop.f32.mrb[8].mxu0 }
 0x8f1   : > { %995 = vst [vmem:[%s1813_s20] sm:$0xff] %v988_v38  ;;  %v990_v39 = vpop.f32.mrb[9].mxu0 }
 0x8f2   : > { %996 = vst [vmem:[%s1813_s20 + $0x8] sm:$0xff] %v990_v39  ;;  %v992_v30 = vpop.f32.mrb[10].mxu0 }
 0x8f3   : > { %v993_v6 = vpop.f32.mrb[11].mxu0 }
 0x8f4   : > { %1470 = shalt.err (!%p1467_p11)
}
 0x8f5   : > { %s1471_s29 = scalar_lea.hbm %s2018_s19, 256  ;;  %s1475_s8 = scalar_lea.hbm %s2066_s2, 512 }
 0x8f6   : > { %p1472_p12 = scmp.ne.s32.totalorder %s2018_s19, %s1471_s29  ;;  %p1476_p10 = scmp.lt.u32.totalorder %s2018_s19, %s2066_s2 }
 0x8f7   : > { %p1477_p6 = scmp.lt.u32.totalorder %s1475_s8, %s1471_s29  ;;  %p1479_p3 = scmp.lt.u32.totalorder %s1471_s29, %s2018_s19 }
 0x8f8   : > { %p1473_p2 = pnand %p1472_p12, %p2096_p7 }
 0x8f9   : > { %p1478_p13 = por %p1477_p6, %p1476_p10 }
 0x8fa   : > { %p1474_p4 = pneg %p1473_p2 }
 0x8fb   : > { %p1480_p5 = por %p1479_p3, %p1478_p13 }
 0x8fd   : > { %p1481_p8 = pnand %p1480_p5, %p1474_p4 }
 0x8ff   : > { %1484 = shalt.err (!%p1481_p8)
}
 0x900   : > { %1212 = dma.vmem_to_hbm [thread:$0]  (%p2096_p7), %s2020_s4, 256, %s2018_s19, %s998_s24  }
 0x901 PF: > { %s1024_s26 = sand.u32 1, %s1555_s9   ;;  %p2097_p9 = scmp.ne.s32.totalorder %s2072_s22, 0 }
 0x902   : > { %p2098_p0 = scmp.ge.s32.totalorder %s1567_s12, 2  ;;  %s1025_s7 = scalar_lea.sflag [#allocation4], %s1024_s26 }
 0x904   : > { %p1222_p1 = pnand %p2098_p0, %p2097_p9 }
 0x906   : > { %1550 = dma.done.wait (!%p1222_p1), %s1025_s7, 256  }
 0x907   : > { %1552 = vsyncadd (!%p1222_p1), %s1025_s7, 4294967040  ;;  %p18_p11 = scmp.ge.s32.totalorder %s1656_s15, 4   ;;  %s2099_s9 = smov %s1559_s10 }
 0x908   : > { %s2100_s10 = smov %s1563_s11  ;;  %s2101_s11 = smov %s1668_s18 }
 0x909   : > { %s2102_s12 = smov %s1656_s15  ;;  %20 = sbr.rel (!%p18_p11) target bundleno = 7 (0x7), region = 104 }
 0x910   :  { %1030 = vsyncpa [#allocation3], 1 }
 0x911   :  { %1032 = vsyncpa [#allocation3 + $0x1], 1 }
 0x912   :  { %1033 = vsyncpa [#allocation6], 1 }
 0x913   :  { %1035 = vsyncpa [#allocation6 + $0x1], 1 }
 0x914   :  { %1036 = vsyncpa [#allocation4], 1 }
 0x915   :  { %1038 = vsyncpa [#allocation4 + $0x1], 1 }

</bundles_post_ra>
